<compile_context>
chip_gen: v7x
topology: tpu7x:2x2x1
jax: 0.10.0
libtpu: 0.0.40
codegen_flags: <defaults>
</compile_context>

<pallas_src>
import functools

import jax
import jax.numpy as jnp
from jax.experimental import pallas as pl
from jax.experimental.pallas import tpu as pltpu


def _outconv_kernel(x_ref, w_ref, b_ref, o_ref):
    # x_ref: (C_in, tm)   w_ref: (C_out, C_in)   b_ref: (C_out, 1)
    # o_ref: (C_out, tm)  -- tm is the lane-dense axis.
    #
    # The channel contraction is tiny; the kernel is HBM-bound, so the MXU
    # cost of this small jnp.dot is fully hidden behind the activation DMAs.
    acc = jnp.dot(w_ref[...], x_ref[...], preferred_element_type=jnp.float32)
    o_ref[...] = (acc + b_ref[...]).astype(o_ref.dtype)


def _round_up(v, m):
    return (v + m - 1) // m * m


def _vmem_plan():
    """Pick a (tile budget, scoped limit) pair for the local TPU generation."""
    try:
        vmem_physical = int(pltpu.get_tpu_info().vmem_capacity_bytes)
    except Exception:
        vmem_physical = 64 * 1024 * 1024      # conservative: assume v7x-sized VMEM
    if vmem_physical >= 128 * 1024 * 1024:    # v5e / v6e
        vmem_budget = 48 * 1024 * 1024
    else:                                     # v7x (64 MiB physical)
        vmem_budget = 24 * 1024 * 1024
    vmem_limit = min(vmem_physical - 8 * 1024 * 1024,
                     vmem_budget + 16 * 1024 * 1024)
    return vmem_budget, vmem_limit


@functools.partial(jax.jit, static_argnames=("tm_max",))
def outconv(x, weight, bias, *, tm_max=None):
    """1x1 conv, stride 1, no padding (PyTorch nn.Conv2d(kernel_size=1) forward).

    Args:
      x:      (N, C_in, H, W)  -- NCHW, matching PyTorch.  f32 or bf16.
      weight: (C_out, C_in, 1, 1)
      bias:   (C_out,)
    Returns:
      (N, C_out, H, W), same dtype as x.
    """
    N, C_in, H, W = x.shape
    C_out = weight.shape[0]
    M = H * W
    itemsize = x.dtype.itemsize

    # Free, contiguous reshapes only: no transposes, no padding copies.
    x_rows = x.reshape(N, C_in, M)                       # spatial is lane-dense
    w_mat = weight.reshape(C_out, C_in).astype(x.dtype)  # tiny, resident
    b_col = bias.reshape(C_out, 1).astype(jnp.float32)   # added in f32

    # Spatial tile: as large as the per-generation VMEM budget allows
    # (double-buffered in + out tiles), multiple of 128 for unmasked stores.
    vmem_budget, vmem_limit = _vmem_plan()
    bytes_per_col = (C_in + C_out) * itemsize
    cols_cap = max(128, (vmem_budget // (2 * bytes_per_col)) // 128 * 128)
    tile_cap = cols_cap if tm_max is None else min(tm_max, cols_cap)

    if M <= tile_cap:
        if N == 1 and M >= 2 * 128:
            # Single batch: split spatially so v7x's two TCs both get work and
            # the DMA/compute/writeback pipeline has >=2 steps.
            tm = _round_up(pl.cdiv(M, 2), 128)
            n_m = pl.cdiv(M, tm)
        else:
            tm = M                   # full-extent last dim: any size is legal
            n_m = 1
    else:
        # Balanced tiles: no tiny ragged tail paying full per-step overhead.
        n_m = pl.cdiv(M, tile_cap)
        tm = _round_up(pl.cdiv(M, n_m), 128)
        n_m = pl.cdiv(M, tm)         # ragged last block (if any) is safe: each
                                     # output column depends only on the same
                                     # input column; OOB columns never stored.

    grid = (N, n_m)                  # both parallel -> feeds both v7x TCs

    cost = pl.CostEstimate(
        flops=2 * N * M * C_in * C_out,
        transcendentals=0,
        bytes_accessed=(N * M * (C_in + C_out) * itemsize
                        + C_out * C_in * itemsize + C_out * 4),
    )

    out_rows = pl.pallas_call(
        _outconv_kernel,
        out_shape=jax.ShapeDtypeStruct((N, C_out, M), x.dtype),
        grid_spec=pltpu.PrefetchScalarGridSpec(
            num_scalar_prefetch=0,
            grid=grid,
            in_specs=[
                # Activation tile: (C_in, tm); batch dim squeezed away.
                pl.BlockSpec((None, C_in, tm), lambda n, m: (n, 0, m)),
                # Weight / bias: tiny, resident (constant index map).
                pl.BlockSpec((C_out, C_in), lambda n, m: (0, 0)),
                pl.BlockSpec((C_out, 1), lambda n, m: (0, 0)),
            ],
            out_specs=pl.BlockSpec((None, C_out, tm), lambda n, m: (n, 0, m)),
        ),
        compiler_params=pltpu.CompilerParams(
            dimension_semantics=("parallel", "parallel"),
            vmem_limit_bytes=int(vmem_limit)),
        cost_estimate=cost,
    )(x_rows, w_mat, b_col)

    return out_rows.reshape(N, C_out, H, W)          # free reshape back to NCHW


def outconv_reference(x, weight, bias):
    # Pure-JAX reference: 1x1 conv == einsum over channels.
    w = weight.reshape(weight.shape[0], weight.shape[1])   # (C_out, C_in)
    y = jnp.einsum("nchw,oc->nohw", x.astype(jnp.float32), w.astype(jnp.float32))
    return (y + bias.astype(jnp.float32)[None, :, None, None]).astype(x.dtype)


if __name__ == "__main__":
    key = jax.random.PRNGKey(0)
    k_x, k_w, k_b, k_x2 = jax.random.split(key, 4)

    N, C_in, C_out, H, W = 2, 4, 3, 16, 16

    x = jax.random.normal(k_x, (N, C_in, H, W), dtype=jnp.float32)
    # Deterministic init mimicking PyTorch Conv2d default (uniform +/- 1/sqrt(fan_in)).
    bound = 1.0 / jnp.sqrt(jnp.float32(C_in * 1 * 1))
    weight = jax.random.uniform(k_w, (C_out, C_in, 1, 1), dtype=jnp.float32,
                                minval=-bound, maxval=bound)
    bias = jax.random.uniform(k_b, (C_out,), dtype=jnp.float32,
                              minval=-bound, maxval=bound)

    out = outconv(x, weight, bias)
    out = jax.block_until_ready(out)
    ref = outconv_reference(x, weight, bias)
    assert out.shape == (N, C_out, H, W), out.shape
    assert jnp.allclose(out, ref, atol=1e-5, rtol=1e-5), "mismatch vs reference"

    # Second check: N == 1 with H*W not a multiple of 128 exercises the
    # forced spatial split and the ragged last block (masked writeback).
    x2 = jax.random.normal(k_x2, (1, C_in, 18, 18), dtype=jnp.float32)
    out2 = jax.block_until_ready(outconv(x2, weight, bias))
    ref2 = outconv_reference(x2, weight, bias)
    assert out2.shape == (1, C_out, 18, 18), out2.shape
    assert jnp.allclose(out2, ref2, atol=1e-5, rtol=1e-5), "mismatch (ragged path)"

    print("KERNEL_OK")
</pallas_src>

<mosaic_0001>
module attributes {stable_mosaic.version = 11 : i64} {
  func.func @_outconv_kernel(%arg0: i32, %arg1: i32, %arg2: memref<1x4x256xf32, #tpu.memory_space<vmem>>, %arg3: memref<3x4xf32, #tpu.memory_space<vmem>>, %arg4: memref<3x1xf32, #tpu.memory_space<vmem>>, %arg5: memref<1x3x256xf32, #tpu.memory_space<vmem>>) attributes {dimension_semantics = [#tpu.dimension_semantics<parallel>, #tpu.dimension_semantics<parallel>], iteration_bounds = array<i64: 2, 1>, scalar_prefetch = 0 : i64, scratch_operands = 0 : i64, tpu.core_type = #tpu.core_type<tc>, window_params = [{transform_indices = @transform_0, window_bounds = array<i64: 1, 4, 256>}, {pipeline_mode = #tpu.pipeline_mode<synchronous>, transform_indices = @transform_1, window_bounds = array<i64: 3, 4>}, {pipeline_mode = #tpu.pipeline_mode<synchronous>, transform_indices = @transform_2, window_bounds = array<i64: 3, 1>}, {transform_indices = @transform_3, window_bounds = array<i64: 1, 3, 256>}]} {
    %c0 = arith.constant 0 : index
    %c0_0 = arith.constant 0 : index
    %0 = vector.load %arg3[%c0, %c0_0] : memref<3x4xf32, #tpu.memory_space<vmem>>, vector<3x4xf32>
    %c0_1 = arith.constant 0 : index
    %c0_2 = arith.constant 0 : index
    %c0_3 = arith.constant 0 : index
    %1 = vector.load %arg2[%c0_1, %c0_2, %c0_3] : memref<1x4x256xf32, #tpu.memory_space<vmem>>, vector<1x4x256xf32>
    %2 = vector.shape_cast %1 : vector<1x4x256xf32> to vector<4x256xf32>
    %cst = arith.constant dense<0.000000e+00> : vector<3x256xf32>
    %3 = tpu.matmul %0, %2, %cst {dimension_numbers = #tpu.dot_dimension_numbers<[1], [0], [0], [1], [0, 0, 1, 1], [], []>} : vector<3x4xf32>, vector<4x256xf32>, vector<3x256xf32> -> vector<3x256xf32>
    %c0_4 = arith.constant 0 : index
    %c0_5 = arith.constant 0 : index
    %4 = vector.load %arg4[%c0_4, %c0_5] : memref<3x1xf32, #tpu.memory_space<vmem>>, vector<3x1xf32>
    %5 = vector.broadcast %4 : vector<3x1xf32> to vector<3x256xf32>
    %6 = arith.addf %3, %5 : vector<3x256xf32>
    %c0_6 = arith.constant 0 : index
    %c0_7 = arith.constant 0 : index
    %c0_8 = arith.constant 0 : index
    %7 = vector.load %arg5[%c0_6, %c0_7, %c0_8] : memref<1x3x256xf32, #tpu.memory_space<vmem>>, vector<1x3x256xf32>
    %8 = vector.shape_cast %7 : vector<1x3x256xf32> to vector<3x256xf32>
    %9 = vector.shape_cast %6 : vector<3x256xf32> to vector<1x3x256xf32>
    tpu.vector_store %arg5[%c0_6, %c0_7, %c0_8], %9 {strides = array<i32>} : memref<1x3x256xf32, #tpu.memory_space<vmem>>, vector<1x3x256xf32>,
    return
  }
  func.func @transform_0(%arg0: i32, %arg1: i32) -> (i32, i32, i32) {
    %c0_i32 = arith.constant 0 : i32
    %c0_i32_0 = arith.constant 0 : i32
    return %arg0, %c0_i32, %arg1 : i32, i32, i32
  }
  func.func @transform_1(%arg0: i32, %arg1: i32) -> (i32, i32) {
    %c0_i32 = arith.constant 0 : i32
    %c0_i32_0 = arith.constant 0 : i32
    %c0_i32_1 = arith.constant 0 : i32
    return %c0_i32, %c0_i32_0 : i32, i32
  }
  func.func @transform_2(%arg0: i32, %arg1: i32) -> (i32, i32) {
    %c0_i32 = arith.constant 0 : i32
    %c0_i32_0 = arith.constant 0 : i32
    %c0_i32_1 = arith.constant 0 : i32
    return %c0_i32, %c0_i32_0 : i32, i32
  }
  func.func @transform_3(%arg0: i32, %arg1: i32) -> (i32, i32, i32) {
    %c0_i32 = arith.constant 0 : i32
    %c0_i32_0 = arith.constant 0 : i32
    return %arg0, %c0_i32, %arg1 : i32, i32, i32
  }
}

</mosaic_0001>

<bundles_post_ra>
// kernel: outconv.1
= control target key start
LH: loop header
LB: loop body
LE: loop exit
PB: predicated region body
PF: predicated region fallthrough
CT: control target
= control target key end

     0   :  { %s482_s12 = smov 0   ;;  %s484_s13 = smov 0   ;;  %s521_s0 = inlined_call_operand.vmem [shape: f32[2,4,256], index: 0, kind: input, shape index: {}]   ;;  %s522_s1 = inlined_call_operand.vmem [shape: f32[3,4], index: 1, kind: input, shape index: {}]   ;;  %s523_s2 = inlined_call_operand.vmem [shape: f32[3,1], index: 2, kind: input, shape index: {}]   ;;  %s524_s3 = inlined_call_operand.vmem [shape: f32[2,3,256], index: 3, kind: output, shape index: {}]  }
   0x1   :  { %s486_s14 = smov 0  }
   0x2 LB: > { %s25_s15 = sadd.s32 1, %s454_s13  ;;  %p396_p0 = scmp.ge.s32.totalorder %s458_s14, 1  ;;  %s458_s14 = sphi %s486_s14, %s13_s14   ;;  %s454_s13 = sphi %s484_s13, %s526_s13   ;;  %s450_s12 = sphi %s482_s12, %s525_s12  }
   0x3   : > { %p27_p1 = scmp.ge.s32.totalorder %s25_s15, 2  ;;  %p158_p2 = scmp.lt.s32.totalorder %s458_s14, 3 }
   0x5   : > { %s528_s15 = smov (%p27_p1, %s25_s15), 0  ;;  %p159_p3 = pnand %p396_p0, %p158_p2 }
   0x6   : > { %p191_p4 = scmp.lt.s32.totalorder (!%p159_p3), %s450_s12, 1  ;;  %v460_v0 = vmov (!%p159_p3), 0.0   ;;  %v212_v1 = vld [vmem:[%s523_s2] sm:$0x7] (!%p159_p3)  ;;  %v461_v2 = vmov (!%p159_p3), 0   ;;  %vm224_vm0 = vcmask (!%p159_p3), 1043456  }
   0x7   : > { %162 = sbr.rel (%p159_p3) target bundleno = 240 (0xf0), region = 32  ;;  %293 = vmatprep.mubr.f32.mxu0 (!%p159_p3), %v460_v0  ;;  %434 = vset.pattern.permute.xlu0 (!%p159_p3), %v461_v2  ;;  %v210_v5 = vld [vmem:[%s522_s1] sm:$0x7] (!%p159_p3)  ;;  %vm220_vm1 = vcmask (!%p159_p3), 31744  }
   0x8   : > { %215 = vperm.xlu0 (!%p159_p3), %434, %v212_v1  }
   0xe   : > { %s530_s12 = smov (!%p191_p4, %s450_s12), 1 }
   0xf   : > { %s406_s18 = sshll.u32 %s530_s12, 3 }
  0x10   : > { %s198_s21 = scalar_lea.vmem %s521_s0, %s406_s18  ;;  %s208_s26 = scalar_lea.vmem %s524_s3, %s406_s18 }
  0x11   : > { %v211_v3 = vld [vmem:[%s198_s21] sm:$0xff] }
  0x12   : > { %v219_v4 = vcombine.high %v211_v3, %v211_v3 }
  0x14   : > { %401 = vmatprep.subr.msk.mxu0 %vm224_vm0, %v219_v4 }
  0x15   : > { %402 = vmatpush1.msk.msra.mxu0 %vm224_vm0, %v211_v3 }
  0x16   : > { %403 = vmatmul.mubr.msk.f32.vlgmr.msra.gmra.mrb[0].mxu0 %vm220_vm1, %v210_v5 }
  0x87   : > { %v216_v6 = vpop.permute.xlu0 %215 }
  0xe9   : > { %v295_v7 = vpop.f32.mrb[0].mxu0 }
  0xea   : > { %v296_v8 = vadd.f32 %v295_v7, %v216_v6  ;;  %v297_v9 = vpop.f32.mrb[1].mxu0 }
  0xeb   : > { %v298_v10 = vadd.f32 %v297_v9, %v216_v6 }
  0xed   : > { %v302_v11 = vcombine.low %v296_v8, %v298_v10 }
  0xef   : > { %304 = vst [vmem:[%s208_s26] sm:$0x77] %v302_v11 }
  0xf0 PF: > { %s13_s14 = sadd.s32 1, %s458_s14   ;;  %s525_s12 = smov %s454_s13 }
  0xf1   : > { %p10_p5 = scmp.ge.s32.totalorder %s13_s14, 4   ;;  %s526_s13 = smov %s528_s15 }
  0xf3   :  { %12 = sbr.rel (!%p10_p5) target bundleno = 2 (0x2), region = 62 }

</bundles_post_ra>
